<compile_context>
chip_gen: v5e
topology: v5e:2x2
jax: 0.10.0
libtpu: 0.0.40
codegen_flags: <defaults>
</compile_context>

<pallas_src>
import jax
import jax.numpy as jnp
from jax.experimental import pallas as pl
from jax.experimental.pallas import tpu as pltpu

H_DIM = 30
# nn.LeakyReLU(True): positional arg is negative_slope; bool True -> 1.0 (identity).
NEG_SLOPE = 1.0
LANE = 128


def _leaky_relu(v, slope):
    return jnp.where(v >= 0, v, slope * v)


def discriminator_kernel(coef_ref, x_ref, out_ref):
    """One batch tile.

    coef_ref : SMEM (3,) f32 = [a, b, c], the folded affine map.
    x_ref    : VMEM (2, TN) f32 — row 0 = feature 0, row 1 = feature 1,
               batch on the 128-lane axis.
    out_ref  : VMEM (1, TN) f32 — sigmoid(a*x0 + b*x1 + c), lane-dense.
    """
    a = coef_ref[0]
    b = coef_ref[1]
    c = coef_ref[2]

    h = a * x_ref[0:1, :] + b * x_ref[1:2, :] + c          # (1, TN), pure VPU
    e = jnp.exp(-h)                                        # EUP
    out_ref[...] = pl.reciprocal(1.0 + e, approx=True)     # EUP, off the VALU slots


def discriminator_forward(x, params, *, tile_n=65536):
    """x: (N, 2) float32  ->  (N,) float32 (matches output.view(-1))."""
    n = x.shape[0]
    w1, b1, w2, b2, w3, b3, w4, b4 = params

    # Fold the four linear layers (LeakyReLU(slope=1.0) is the identity) into a
    # single affine map: out = sigmoid(x @ w_eff + b_eff).
    w_eff = w1 @ w2 @ w3 @ w4                               # (2, 1)
    b_eff = ((b1 @ w2 + b2) @ w3 + b3) @ w4 + b4            # (1, 1)
    coef = jnp.concatenate(
        [w_eff.reshape(-1), b_eff.reshape(-1)]).astype(jnp.float32)   # (3,) = [a,b,c]

    # Lane-dense layout: batch on the lane axis.  Pad only to a multiple of 128;
    # any ragged last grid block is masked by Pallas, so no tile-sized pad copy.
    n_128 = pl.cdiv(n, LANE) * LANE
    x_t = jnp.pad(x.T, ((0, 0), (0, n_128 - n)))            # (2, n_128), one fused copy

    # Largest tile that still leaves >= 2 grid steps (so the "parallel" axis can
    # actually be split across v7x's two TensorCores).  VMEM per step is only
    # ~12 * tn bytes double-buffered, far under every chip's budget.
    tile_n = pl.cdiv(tile_n, LANE) * LANE
    half = pl.cdiv(pl.cdiv(n_128, 2), LANE) * LANE
    tn = max(LANE, min(tile_n, half))
    grid = (pl.cdiv(n_128, tn),)

    out = pl.pallas_call(
        discriminator_kernel,
        out_shape=jax.ShapeDtypeStruct((1, n_128), jnp.float32),
        grid=grid,
        in_specs=[
            pl.BlockSpec(memory_space=pltpu.MemorySpace.SMEM),   # folded coefficients
            pl.BlockSpec((2, tn), lambda i: (0, i)),             # x^T batch tile
        ],
        out_specs=pl.BlockSpec((1, tn), lambda i: (0, i)),
        compiler_params=pltpu.CompilerParams(
            dimension_semantics=("parallel",),                   # shard across TCs on v7x
            vmem_limit_bytes=32 * 1024 * 1024,
        ),
    )(coef, x_t)

    return out[0, :n]


def init_params(key):
    """Deterministic synthetic init (shapes from the module's __init__)."""
    ks = jax.random.split(key, 8)
    scale = 0.1

    def lin(kw, kb, fan_in, fan_out):
        w = scale * jax.random.normal(kw, (fan_in, fan_out), dtype=jnp.float32)
        b = scale * jax.random.normal(kb, (1, fan_out), dtype=jnp.float32)
        return w, b

    w1, b1 = lin(ks[0], ks[1], 2, H_DIM)
    w2, b2 = lin(ks[2], ks[3], H_DIM, H_DIM)
    w3, b3 = lin(ks[4], ks[5], H_DIM, H_DIM)
    w4, b4 = lin(ks[6], ks[7], H_DIM, 1)
    return (w1, b1, w2, b2, w3, b3, w4, b4)


def reference_forward(x, params):
    """Pure-JAX reference mirroring the PyTorch module layer by layer."""
    w1, b1, w2, b2, w3, b3, w4, b4 = params
    h = _leaky_relu(x @ w1 + b1, NEG_SLOPE)
    h = _leaky_relu(h @ w2 + b2, NEG_SLOPE)
    h = _leaky_relu(h @ w3 + b3, NEG_SLOPE)
    h = jax.nn.sigmoid(h @ w4 + b4)
    return h.reshape(-1)


if __name__ == "__main__":
    key = jax.random.PRNGKey(0)
    k_x, k_p = jax.random.split(key)
    params = init_params(k_p)

    # Tolerance: folding is exact up to fp reassociation; pl.reciprocal(approx=True)
    # contributes up to ~1e-3 abs error on sigmoid outputs in (0, 1).
    ATOL, RTOL = 2e-3, 2e-3

    # 1) Single-tile path (batch padded 8 -> 128 lanes).
    batch = 8
    x = jax.random.normal(k_x, (batch, 2), dtype=jnp.float32)
    out = jax.block_until_ready(discriminator_forward(x, params))
    ref = reference_forward(x, params)
    assert out.shape == (batch,), out.shape
    assert jnp.allclose(out, ref, atol=ATOL, rtol=RTOL), (out, ref)

    # 2) Multi-tile + ragged last block (n_128=384, tn=256 -> grid=2, last block masked).
    batch2 = 300
    x2 = jax.random.normal(jax.random.fold_in(k_x, 1), (batch2, 2), dtype=jnp.float32)
    out2 = jax.block_until_ready(discriminator_forward(x2, params))
    ref2 = reference_forward(x2, params)
    assert out2.shape == (batch2,), out2.shape
    assert jnp.allclose(out2, ref2, atol=ATOL, rtol=RTOL), (out2, ref2)

    # 3) Explicit small-tile grid path (grid=3, evenly divisible).
    out3 = jax.block_until_ready(discriminator_forward(x2, params, tile_n=128))
    assert out3.shape == (batch2,), out3.shape
    assert jnp.allclose(out3, ref2, atol=ATOL, rtol=RTOL), (out3, ref2)

    print("KERNEL_OK")
</pallas_src>

<mosaic_0001>
module attributes {stable_mosaic.version = 11 : i64} {
  func.func @discriminator_kernel(%arg0: i32, %arg1: memref<3xf32, #tpu.memory_space<smem>>, %arg2: memref<2x128xf32, #tpu.memory_space<vmem>>, %arg3: memref<1x128xf32, #tpu.memory_space<vmem>>) attributes {dimension_semantics = [#tpu.dimension_semantics<parallel>], iteration_bounds = array<i64: 1>, scalar_prefetch = 0 : i64, scratch_operands = 0 : i64, tpu.core_type = #tpu.core_type<tc>, window_params = [{transform_indices = @transform_0, window_bounds = array<i64: 3>}, {transform_indices = @transform_1, window_bounds = array<i64: 2, 128>}, {transform_indices = @transform_2, window_bounds = array<i64: 1, 128>}]} {
    %c0 = arith.constant 0 : index
    %0 = memref.load %arg1[%c0] : memref<3xf32, #tpu.memory_space<smem>>
    %c1 = arith.constant 1 : index
    %1 = memref.load %arg1[%c1] : memref<3xf32, #tpu.memory_space<smem>>
    %c2 = arith.constant 2 : index
    %2 = memref.load %arg1[%c2] : memref<3xf32, #tpu.memory_space<smem>>
    %c0_0 = arith.constant 0 : index
    %c0_1 = arith.constant 0 : index
    %3 = vector.load %arg2[%c0_0, %c0_1] : memref<2x128xf32, #tpu.memory_space<vmem>>, vector<1x128xf32>
    %4 = vector.broadcast %0 : f32 to vector<1x128xf32>
    %5 = arith.mulf %4, %3 : vector<1x128xf32>
    %c1_2 = arith.constant 1 : index
    %c0_3 = arith.constant 0 : index
    %6 = vector.load %arg2[%c1_2, %c0_3] : memref<2x128xf32, #tpu.memory_space<vmem>>, vector<1x128xf32>
    %7 = vector.broadcast %1 : f32 to vector<1x128xf32>
    %8 = arith.mulf %7, %6 : vector<1x128xf32>
    %9 = arith.addf %5, %8 : vector<1x128xf32>
    %10 = vector.broadcast %2 : f32 to vector<1x128xf32>
    %11 = arith.addf %9, %10 : vector<1x128xf32>
    %cst = arith.constant 0.000000e+00 : f32
    %12 = vector.broadcast %cst : f32 to vector<1x128xf32>
    %13 = arith.subf %12, %11 : vector<1x128xf32>
    %14 = math.exp %13 : vector<1x128xf32>
    %cst_4 = arith.constant 1.000000e+00 : f32
    %15 = vector.broadcast %cst_4 : f32 to vector<1x128xf32>
    %16 = arith.addf %15, %14 : vector<1x128xf32>
    %17 = tpu.reciprocal %16 {approx = true} : vector<1x128xf32> -> vector<1x128xf32>
    %c0_5 = arith.constant 0 : index
    %c0_6 = arith.constant 0 : index
    %18 = vector.load %arg3[%c0_5, %c0_6] : memref<1x128xf32, #tpu.memory_space<vmem>>, vector<1x128xf32>
    tpu.vector_store %arg3[%c0_5, %c0_6], %17 {strides = array<i32>} : memref<1x128xf32, #tpu.memory_space<vmem>>, vector<1x128xf32>,
    return
  }
  func.func @transform_0(%arg0: i32) -> i32 {
    %c0_i32 = arith.constant 0 : i32
    %c0_i32_0 = arith.constant 0 : i32
    return %c0_i32 : i32
  }
  func.func @transform_1(%arg0: i32) -> (i32, i32) {
    %c0_i32 = arith.constant 0 : i32
    %c0_i32_0 = arith.constant 0 : i32
    return %c0_i32, %arg0 : i32, i32
  }
  func.func @transform_2(%arg0: i32) -> (i32, i32) {
    %c0_i32 = arith.constant 0 : i32
    %c0_i32_0 = arith.constant 0 : i32
    return %c0_i32, %arg0 : i32, i32
  }
}

</mosaic_0001>

<bundles_post_ra>
// kernel: tpu_custom_call.1
= control target key start
LH: loop header
LB: loop body
LE: loop exit
PB: predicated region body
PF: predicated region fallthrough
CT: control target
= control target key end

     0   :  { %7 = vsyncpa [#allocation5], 0  ;;  %s177_s0 = inlined_call_operand.hbm [shape: f32[3], index: 0, kind: input, shape index: {}]   ;;  %s178_s1 = inlined_call_operand.hbm [shape: f32[2,128], index: 1, kind: input, shape index: {}]   ;;  %s179_s2 = inlined_call_operand.hbm [shape: f32[1,128], index: 2, kind: output, shape index: {}]  }
   0x1   :  { %8 = vsyncpa [#allocation3], 0 }
   0x2   :  { %9 = vsyncpa [#allocation4], 0  ;;  %s15_s11 = sshll.u32 %s177_s0, 4  ;;  %s24_s14 = sshll.u32 %s178_s1, 4  ;;  %s16_s11 = int_to_ptr.hbm [resolvable:$true] %s15_s11  ;;  %s25_s14 = int_to_ptr.hbm [resolvable:$true] %s24_s14 }
   0x3   :  { %s150_s15 = smov [#allocation2]   ;;  %s151_s16 = smov [#allocation6]  }
   0x4   :  { %18 = dma.hbm_to_smem %s16_s11, 16, %s150_s15, [#allocation5]  }
   0x5   :  { %s26_s17 = sshll.u32 %s151_s16, 4  ;;  %s27_s17 = int_to_ptr.vmem [resolvable:$true] %s26_s17 }
   0x6   :  { %29 = dma.hbm_to_vmem [thread:$0]  %s25_s14, 32, %s27_s17, [#allocation3]  }
   0x7   :  { %144 = dma.done.wait [#allocation5], 16  }
   0x8   :  { %145 = vsyncadd [#allocation5], 4294967280 }
   0x9   :  { %146 = dma.done.wait [#allocation3], 32  }
   0xa   :  { %147 = vsyncadd [#allocation3], 4294967264 }
   0xb   :  { %38 = sfence }
   0xc   :  { %s39_s18 = sld [smem:[#allocation2]]  ;;  %v42_v0 = vld [vmem:[#allocation6] sm:$0x1]  ;;  %v45_v1 = vld [vmem:[#allocation6 + $0x1] sm:$0x1]  ;;  %s152_s1 = smov [#allocation7]  }
   0xd   :  { %s75_s19 = sld [smem:[#allocation2 + $0x1]]  ;;  %s62_s20 = sshll.u32 %s152_s1, 4  ;;  %s63_s20 = int_to_ptr.vmem [resolvable:$true] %s62_s20 }
   0xe   :  { %s76_s0 = sld [smem:[#allocation2 + $0x2]]  ;;  %s64_s23 = sshll.u32 %s179_s2, 4  ;;  %s65_s23 = int_to_ptr.hbm [resolvable:$true] %s64_s23 }
  0x12   :  { %v43_v2 = vstv %s39_s18 }
  0x13   :  { %v44_v3 = vmul.f32 %v43_v2, %v42_v0  ;;  %v46_v4 = vstv %s75_s19 }
  0x14   :  { %v47_v5 = vmul.f32 %v46_v4, %v45_v1  ;;  %v49_v6 = vstv %s76_s0 }
  0x16   :  { %v48_v7 = vadd.f32 %v47_v5, %v44_v3 }
  0x18   :  { %v50_v8 = vadd.f32 %v49_v6, %v48_v7 }
  0x1a   :  { %v51_v9 = vsub.f32 0.0, %v50_v8 }
  0x1c   :  { %v52_v10 = vmul.f32 1.442695, %v51_v9 }
  0x1e   :  { %80 = vpow2.f32 %v52_v10 }
  0x24   :  { %v81_v11 = vpop.eup %80 }
  0x25   :  { %v54_v12 = vadd.f32 1.0, %v81_v11 }
  0x27   :  { %82 = vrcp.f32 %v54_v12 }
  0x2d   :  { %v83_v13 = vpop.eup %82 }
  0x2e   :  { %56 = vst [vmem:[#allocation7] sm:$0x1] %v83_v13 }
  0x2f   :  { %67 = dma.vmem_to_hbm [thread:$0]  %s63_s20, 16, %s65_s23, [#allocation4]  }
  0x30   :  { %148 = dma.done.wait [#allocation4], 16  }
  0x31   :  { %149 = vsyncadd [#allocation4], 4294967280 }
  0x32   :  { %72 = vsyncpa [#allocation3], 1 }
  0x33   :  { %73 = vsyncpa [#allocation4], 1 }
  0x34   :  { %74 = vsyncpa [#allocation5], 1 }

</bundles_post_ra>
